<compile_context>
chip_gen: v5e
topology: v5e:2x2
jax: 0.10.0
libtpu: 0.0.40
codegen_flags: <defaults>
</compile_context>

<pallas_src>
import jax
import jax.numpy as jnp
from jax.experimental import pallas as pl
from jax.experimental.pallas import tpu as pltpu

_LANE = 128
_SUBLANE = 8
# Whole-batch-in-one-step cutoff: at indim=32/hidden=128/outdim=16 f32 this is
# ~1 MiB of x + ~0.25 MiB of output per buffer — far under every generation's
# scoped VMEM (16 MiB v5e, 32 MiB v6e/v7x defaults).
_SINGLE_STEP_MAX_ROWS = 4096
_TILE_ROWS = 512  # multi-step tile: >=256 for the 2x256^2 MXU, 512 ~ 85% HBM roofline


def _round_up(n, m):
    return (n + m - 1) // m * m


def mlp_kernel(x_ref, w1_ref, b1_ref, w2_ref, b2_ref, o_ref):
    # x:  (tb, indim)          f32
    # w1: (indim, hidden_p)    f32   (pre-transposed once at prep time)
    # b1: (1, hidden_p)        f32
    # w2: (hidden_p, outdim)   f32   (pre-transposed once at prep time)
    # b2: (1, outdim)          f32
    # o:  (tb, outdim)         f32   (unpadded output, masked store is cheap)
    h = jnp.dot(x_ref[...], w1_ref[...], preferred_element_type=jnp.float32)
    h = jnp.maximum(h + b1_ref[...], 0.0)          # bias + ReLU on the VPU
    y = jnp.dot(h, w2_ref[...], preferred_element_type=jnp.float32)
    o_ref[...] = (y + b2_ref[...]).astype(o_ref.dtype)


def prepare_params(w1, b1, w2, b2):
    """One-time parameter prep (NOT on the per-forward hot path).

    - transposes PyTorch (out, in) weights to (in, out) so the kernel's dots
      are canonical (no in-kernel RHS re-orientation),
    - zero-pads hidden 100 -> 128 for lane-dense vregs (exact: padded hidden
      units get bias 0 -> ReLU(0) = 0 and zero outgoing weights),
    - keeps everything float32 (module semantics).
    """
    hidden, indim = w1.shape
    outdim, _ = w2.shape
    hidden_p = _round_up(hidden, _LANE)

    w1_p = jnp.zeros((indim, hidden_p), jnp.float32).at[:, :hidden].set(
        w1.astype(jnp.float32).T)
    b1_p = jnp.zeros((1, hidden_p), jnp.float32).at[0, :hidden].set(
        b1.astype(jnp.float32))
    w2_p = jnp.zeros((hidden_p, outdim), jnp.float32).at[:hidden, :].set(
        w2.astype(jnp.float32).T)
    b2_p = b2.astype(jnp.float32).reshape(1, outdim)
    return dict(w1=w1_p, b1=b1_p, w2=w2_p, b2=b2_p)


def single_layer_mlp(x, params):
    """Forward pass. x: (B, indim) f32; params from prepare_params()."""
    B, indim = x.shape
    w1_p, b1_p = params["w1"], params["b1"]
    w2_p, b2_p = params["w2"], params["b2"]
    hidden_p = w1_p.shape[1]
    outdim = w2_p.shape[1]

    if B <= _SINGLE_STEP_MAX_ROWS:
        # One grid step: block == full array, so no (8,128) divisibility
        # constraint and no wrapper-side padding of x, ever.
        tb = B
    else:
        tb = _TILE_ROWS
    nb = pl.cdiv(B, tb)  # ragged last block handled by Pallas boundary masking

    flops = 2 * B * (indim * hidden_p + hidden_p * outdim)
    bytes_accessed = 4 * (x.size + w1_p.size + b1_p.size + w2_p.size + b2_p.size
                          + B * outdim)

    # Weights/biases are ~66 KB total; double-buffering them across steps is
    # negligible even on v7x's 64 MiB VMEM. If hidden/indim ever grow large,
    # put pipeline_mode=pl.Buffered(1) on the four constant-index specs.
    out = pl.pallas_call(
        mlp_kernel,
        out_shape=jax.ShapeDtypeStruct((B, outdim), x.dtype),
        grid_spec=pltpu.PrefetchScalarGridSpec(
            num_scalar_prefetch=0,
            grid=(nb,),
            in_specs=[
                pl.BlockSpec((tb, indim), lambda i: (i, 0)),
                pl.BlockSpec((indim, hidden_p), lambda i: (0, 0)),
                pl.BlockSpec((1, hidden_p), lambda i: (0, 0)),
                pl.BlockSpec((hidden_p, outdim), lambda i: (0, 0)),
                pl.BlockSpec((1, outdim), lambda i: (0, 0)),
            ],
            out_specs=pl.BlockSpec((tb, outdim), lambda i: (i, 0)),
        ),
        compiler_params=pltpu.CompilerParams(
            # Only ask for megacore sharding when each core gets real work.
            dimension_semantics=("arbitrary",) if nb == 1 else ("parallel",),
            vmem_limit_bytes=32 * 1024 * 1024,
        ),
        cost_estimate=pl.CostEstimate(
            flops=flops, transcendentals=0, bytes_accessed=bytes_accessed),
    )(x, w1_p, b1_p, w2_p, b2_p)
    return out


def reference_mlp(x, w1, b1, w2, b2):
    h = jnp.maximum(x @ w1.T + b1, 0.0)
    return h @ w2.T + b2


if __name__ == "__main__":
    # Module config: SingleLayerMLP(indim=32, outdim=16, hidden_layer=100),
    # small batch per the harness instructions.
    batch, indim, outdim, hidden = 16, 32, 16, 100

    key = jax.random.PRNGKey(0)
    kx, k1w, k1b, k2w, k2b = jax.random.split(key, 5)

    # PyTorch-style nn.Linear init: U(-1/sqrt(fan_in), 1/sqrt(fan_in)).
    bound1 = 1.0 / jnp.sqrt(indim)
    bound2 = 1.0 / jnp.sqrt(hidden)
    w1 = jax.random.uniform(k1w, (hidden, indim), jnp.float32, -bound1, bound1)
    b1 = jax.random.uniform(k1b, (hidden,), jnp.float32, -bound1, bound1)
    w2 = jax.random.uniform(k2w, (outdim, hidden), jnp.float32, -bound2, bound2)
    b2 = jax.random.uniform(k2b, (outdim,), jnp.float32, -bound2, bound2)

    x = jax.random.normal(kx, (batch, indim), jnp.float32)

    params = prepare_params(w1, b1, w2, b2)   # one-time, off the forward path
    out = single_layer_mlp(x, params)
    out = jax.block_until_ready(out)

    ref = reference_mlp(x, w1, b1, w2, b2)

    assert out.shape == (batch, outdim)
    # Tolerance covers the TPU MXU's default matmul precision for f32 operands.
    assert jnp.allclose(out, ref, atol=5e-2, rtol=5e-2), \
        f"mismatch vs f32 reference (max abs err={jnp.max(jnp.abs(out - ref))})"

    print("KERNEL_OK")
</pallas_src>

<mosaic_0001>
module attributes {stable_mosaic.version = 11 : i64} {
  func.func @mlp_kernel(%arg0: i32, %arg1: memref<16x32xf32, #tpu.memory_space<vmem>>, %arg2: memref<32x128xf32, #tpu.memory_space<vmem>>, %arg3: memref<1x128xf32, #tpu.memory_space<vmem>>, %arg4: memref<128x16xf32, #tpu.memory_space<vmem>>, %arg5: memref<1x16xf32, #tpu.memory_space<vmem>>, %arg6: memref<16x16xf32, #tpu.memory_space<vmem>>) attributes {dimension_semantics = [#tpu.dimension_semantics<arbitrary>], iteration_bounds = array<i64: 1>, scalar_prefetch = 0 : i64, scratch_operands = 0 : i64, tpu.core_type = #tpu.core_type<tc>, window_params = [{transform_indices = @transform_0, window_bounds = array<i64: 16, 32>}, {pipeline_mode = #tpu.pipeline_mode<synchronous>, transform_indices = @transform_1, window_bounds = array<i64: 32, 128>}, {pipeline_mode = #tpu.pipeline_mode<synchronous>, transform_indices = @transform_2, window_bounds = array<i64: 1, 128>}, {pipeline_mode = #tpu.pipeline_mode<synchronous>, transform_indices = @transform_3, window_bounds = array<i64: 128, 16>}, {pipeline_mode = #tpu.pipeline_mode<synchronous>, transform_indices = @transform_4, window_bounds = array<i64: 1, 16>}, {transform_indices = @transform_5, window_bounds = array<i64: 16, 16>}]} {
    %c0 = arith.constant 0 : index
    %c0_0 = arith.constant 0 : index
    %0 = vector.load %arg1[%c0, %c0_0] : memref<16x32xf32, #tpu.memory_space<vmem>>, vector<16x32xf32>
    %c0_1 = arith.constant 0 : index
    %c0_2 = arith.constant 0 : index
    %1 = vector.load %arg2[%c0_1, %c0_2] : memref<32x128xf32, #tpu.memory_space<vmem>>, vector<32x128xf32>
    %cst = arith.constant dense<0.000000e+00> : vector<16x128xf32>
    %2 = tpu.matmul %0, %1, %cst {dimension_numbers = #tpu.dot_dimension_numbers<[1], [0], [0], [1], [0, 0, 1, 1], [], []>} : vector<16x32xf32>, vector<32x128xf32>, vector<16x128xf32> -> vector<16x128xf32>
    %c0_3 = arith.constant 0 : index
    %c0_4 = arith.constant 0 : index
    %3 = vector.load %arg3[%c0_3, %c0_4] : memref<1x128xf32, #tpu.memory_space<vmem>>, vector<1x128xf32>
    %4 = vector.broadcast %3 : vector<1x128xf32> to vector<16x128xf32>
    %5 = arith.addf %2, %4 : vector<16x128xf32>
    %cst_5 = arith.constant 0.000000e+00 : f32
    %6 = vector.broadcast %cst_5 : f32 to vector<16x128xf32>
    %7 = arith.maximumf %5, %6 : vector<16x128xf32>
    %c0_6 = arith.constant 0 : index
    %c0_7 = arith.constant 0 : index
    %8 = vector.load %arg4[%c0_6, %c0_7] : memref<128x16xf32, #tpu.memory_space<vmem>>, vector<128x16xf32>
    %cst_8 = arith.constant dense<0.000000e+00> : vector<16x16xf32>
    %9 = tpu.matmul %7, %8, %cst_8 {dimension_numbers = #tpu.dot_dimension_numbers<[1], [0], [0], [1], [0, 0, 1, 1], [], []>} : vector<16x128xf32>, vector<128x16xf32>, vector<16x16xf32> -> vector<16x16xf32>
    %c0_9 = arith.constant 0 : index
    %c0_10 = arith.constant 0 : index
    %10 = vector.load %arg5[%c0_9, %c0_10] : memref<1x16xf32, #tpu.memory_space<vmem>>, vector<1x16xf32>
    %11 = vector.broadcast %10 : vector<1x16xf32> to vector<16x16xf32>
    %12 = arith.addf %9, %11 : vector<16x16xf32>
    %c0_11 = arith.constant 0 : index
    %c0_12 = arith.constant 0 : index
    %13 = vector.load %arg6[%c0_11, %c0_12] : memref<16x16xf32, #tpu.memory_space<vmem>>, vector<16x16xf32>
    tpu.vector_store %arg6[%c0_11, %c0_12], %12 {strides = array<i32>} : memref<16x16xf32, #tpu.memory_space<vmem>>, vector<16x16xf32>,
    return
  }
  func.func @transform_0(%arg0: i32) -> (i32, i32) {
    %c0_i32 = arith.constant 0 : i32
    %c0_i32_0 = arith.constant 0 : i32
    return %arg0, %c0_i32 : i32, i32
  }
  func.func @transform_1(%arg0: i32) -> (i32, i32) {
    %c0_i32 = arith.constant 0 : i32
    %c0_i32_0 = arith.constant 0 : i32
    %c0_i32_1 = arith.constant 0 : i32
    return %c0_i32, %c0_i32_0 : i32, i32
  }
  func.func @transform_2(%arg0: i32) -> (i32, i32) {
    %c0_i32 = arith.constant 0 : i32
    %c0_i32_0 = arith.constant 0 : i32
    %c0_i32_1 = arith.constant 0 : i32
    return %c0_i32, %c0_i32_0 : i32, i32
  }
  func.func @transform_3(%arg0: i32) -> (i32, i32) {
    %c0_i32 = arith.constant 0 : i32
    %c0_i32_0 = arith.constant 0 : i32
    %c0_i32_1 = arith.constant 0 : i32
    return %c0_i32, %c0_i32_0 : i32, i32
  }
  func.func @transform_4(%arg0: i32) -> (i32, i32) {
    %c0_i32 = arith.constant 0 : i32
    %c0_i32_0 = arith.constant 0 : i32
    %c0_i32_1 = arith.constant 0 : i32
    return %c0_i32, %c0_i32_0 : i32, i32
  }
  func.func @transform_5(%arg0: i32) -> (i32, i32) {
    %c0_i32 = arith.constant 0 : i32
    %c0_i32_0 = arith.constant 0 : i32
    return %arg0, %c0_i32 : i32, i32
  }
}

</mosaic_0001>

<bundles_post_ra>
// kernel: tpu_custom_call.1
= control target key start
LH: loop header
LB: loop body
LE: loop exit
PB: predicated region body
PF: predicated region fallthrough
CT: control target
= control target key end

     0   :  { %vm31_vm0 = vcmask 261120   ;;  %s286_s0 = inlined_call_operand.vmem [shape: f32[16,32], index: 0, kind: input, shape index: {}]   ;;  %s287_s1 = inlined_call_operand.vmem [shape: f32[32,128], index: 1, kind: input, shape index: {}]   ;;  %s288_s2 = inlined_call_operand.vmem [shape: f32[1,128], index: 2, kind: input, shape index: {}]   ;;  %s289_s3 = inlined_call_operand.vmem [shape: f32[128,16], index: 3, kind: input, shape index: {}]   ;;  %s290_s4 = inlined_call_operand.vmem [shape: f32[1,16], index: 4, kind: input, shape index: {}]   ;;  %s291_s5 = inlined_call_operand.hbm [shape: f32[16,16], index: 5, kind: output, shape index: {}]  }
   0x1   :  { %v26_v0 = vld [vmem:[%s287_s1 + $0x18] sm:$0xff]  ;;  %v25_v1 = vld [vmem:[%s287_s1 + $0x10] sm:$0xff]  ;;  %v24_v2 = vld [vmem:[%s287_s1 + $0x8] sm:$0xff] }
   0x2   :  { %50 = vmatpush.msra.mxu0 %v26_v0  ;;  %v78_v3 = vld [vmem:[%s289_s3 + $0x78] sm:$0xff]  ;;  %v77_v4 = vld [vmem:[%s289_s3 + $0x70] sm:$0xff]  ;;  %v23_v5 = vld [vmem:[%s287_s1] sm:$0xff] }
   0x3   :  { %83 = vmatpush.msra.mxu1 %v78_v3  ;;  %v76_v6 = vld [vmem:[%s289_s3 + $0x68] sm:$0xff]  ;;  %129 = vmatpush.msra.mxu2 %v78_v3  ;;  %v21_v7 = vld [vmem:[%s286_s0] sm:$0xff] }
   0x4   :  { %51 = vmatpush.msra.mxu0 %v25_v1  ;;  %v75_v8 = vld [vmem:[%s289_s3 + $0x60] sm:$0xff] }
   0x5   :  { %84 = vmatpush.msra.mxu1 %v77_v4  ;;  %130 = vmatpush.msra.mxu2 %v77_v4 }
   0x6   :  { %52 = vmatpush.msra.mxu0 %v24_v2 }
   0x7   :  { %85 = vmatpush.msra.mxu1 %v76_v6 }
   0x8   :  { %53 = vmatpush.msra.mxu0 %v23_v5 }
   0x9   :  { %10 = vsyncpa [#allocation3], 0  ;;  %127 = vmatmul.msk.f32.vlgmr.msra.gmra.mxu0 %vm31_vm0, %v21_v7  ;;  %v74_v9 = vld [vmem:[%s289_s3 + $0x58] sm:$0xff]  ;;  %131 = vmatpush.msra.mxu2 %v76_v6  ;;  %v73_v10 = vld [vmem:[%s289_s3 + $0x50] sm:$0xff]  ;;  %vm106_vm1 = vcmask 130048   ;;  %s115_s15 = sshll.u32 %s291_s5, 4  ;;  %s116_s15 = int_to_ptr.hbm [resolvable:$true] %s115_s15 }
   0xa   :  { %86 = vmatpush.msra.mxu1 %v75_v8  ;;  %v72_v11 = vld [vmem:[%s289_s3 + $0x48] sm:$0xff]  ;;  %v71_v13 = vld [vmem:[%s289_s3 + $0x40] sm:$0xff]  ;;  %v70_v14 = vld [vmem:[%s289_s3 + $0x38] sm:$0xff]  ;;  %s177_s16 = smov 128   ;;  %s178_s17 = smov 8  }
   0xb   :  { %132 = vmatpush.msra.mxu2 %v75_v8  ;;  %v22_v12 = vld [vmem:[%s286_s0 + $0x8] sm:$0xff]  ;;  %v69_v15 = vld [vmem:[%s289_s3 + $0x30] sm:$0xff]  ;;  %v67_v17 = vld [vmem:[%s289_s3 + $0x20] sm:$0xff] }
   0xc   :  { %87 = vmatpush.msra.mxu1 %v74_v9  ;;  %v68_v16 = vld [vmem:[%s289_s3 + $0x28] sm:$0xff]  ;;  %v66_v18 = vld [vmem:[%s289_s3 + $0x18] sm:$0xff]  ;;  %v65_v19 = vld [vmem:[%s289_s3 + $0x10] sm:$0xff] }
   0xd   :  { %133 = vmatpush.msra.mxu2 %v74_v9  ;;  %v64_v20 = vld [vmem:[%s289_s3 + $0x8] sm:$0xff]  ;;  %v63_v21 = vld [vmem:[%s289_s3] sm:$0xff]  ;;  %s176_s3 = smov [#allocation2]  }
   0xe   :  { %88 = vmatpush.msra.mxu1 %v73_v10  ;;  %v148_v22 = vld [vmem:[%s288_s2] ss:$0 sm:$0xff]  ;;  %s113_s13 = sshll.u32 %s176_s3, 4  ;;  %s114_s13 = int_to_ptr.vmem [resolvable:$true] %s113_s13 }
   0xf   :  { %134 = vmatpush.msra.mxu2 %v73_v10  ;;  %v149_v29 = vld [vmem:[%s290_s4] ss:$0 sm:$0xff] }
  0x10   :  { %89 = vmatpush.msra.mxu1 %v72_v11 }
  0x11   :  { %128 = vmatmul.msk.f32.gmra.mxu0 %vm31_vm0, %v22_v12  ;;  %135 = vmatpush.msra.mxu2 %v72_v11 }
  0x12   :  { %90 = vmatpush.msra.mxu1 %v71_v13 }
  0x13   :  { %136 = vmatpush.msra.mxu2 %v71_v13 }
  0x14   :  { %91 = vmatpush.msra.mxu1 %v70_v14 }
  0x15   :  { %137 = vmatpush.msra.mxu2 %v70_v14 }
  0x16   :  { %92 = vmatpush.msra.mxu1 %v69_v15 }
  0x17   :  { %138 = vmatpush.msra.mxu2 %v69_v15 }
  0x18   :  { %93 = vmatpush.msra.mxu1 %v68_v16 }
  0x19   :  { %139 = vmatpush.msra.mxu2 %v68_v16 }
  0x1a   :  { %94 = vmatpush.msra.mxu1 %v67_v17 }
  0x1b   :  { %140 = vmatpush.msra.mxu2 %v67_v17 }
  0x1c   :  { %95 = vmatpush.msra.mxu1 %v66_v18 }
  0x1d   :  { %141 = vmatpush.msra.mxu2 %v66_v18 }
  0x1e   :  { %96 = vmatpush.msra.mxu1 %v65_v19 }
  0x1f   :  { %142 = vmatpush.msra.mxu2 %v65_v19 }
  0x20   :  { %97 = vmatpush.msra.mxu1 %v64_v20 }
  0x21   :  { %143 = vmatpush.msra.mxu2 %v64_v20 }
  0x22   :  { %98 = vmatpush.msra.mxu1 %v63_v21 }
  0x23   :  { %144 = vmatpush.msra.mxu2 %v63_v21 }
  0x86   :  { %v55_v23 = vpop.f32.mrf.mxu0 }
  0x87   :  { %v56_v24 = vadd.f32 %v148_v22, %v55_v23 }
  0x89   :  { %v61_v25 = vmax.f32 %v56_v24, 0.0 }
  0x8b   :  { %99 = vmatmul.f32.vlgmr.msra.gmra.mxu1 %v61_v25 }
  0x8e   :  { %v58_v26 = vpop.f32.mrf.mxu0 }
  0x8f   :  { %v59_v27 = vadd.f32 %v148_v22, %v58_v26 }
  0x91   :  { %v62_v28 = vmax.f32 %v59_v27, 0.0 }
  0x93   :  { %102 = vmatmul.f32.vlgmr.msra.gmra.mxu2 %v62_v28 }
 0x108   :  { %v100_v30 = vpop.f32.mrf.mxu1 }
 0x109   :  { %v101_v31 = vadd.f32 %v149_v29, %v100_v30 }
 0x10b   :  { %107 = vst.msk [vmem:[#allocation2] sm:$0xff] %vm106_vm1, %v101_v31 }
 0x116   :  { %v103_v32 = vpop.f32.mrf.mxu2 }
 0x117   :  { %v104_v33 = vadd.f32 %v149_v29, %v103_v32 }
 0x119   :  { %108 = vst.msk [vmem:[#allocation2 + $0x8] sm:$0xff] %vm106_vm1, %v104_v33 }
 0x11a   :  { %121 = dma.vmem_to_hbm [thread:$0]  %s114_s13, 256, %s116_s15, [#allocation3], %s177_s16, %s177_s16, %s178_s17  }
 0x11b   :  { %174 = dma.done.wait [#allocation3], 256  }
 0x11c   :  { %175 = vsyncadd [#allocation3], 4294967040 }
 0x11d   :  { %126 = vsyncpa [#allocation3], 1 }

</bundles_post_ra>
